<compile_context>
chip_gen: v5e
topology: v5e:2x2
jax: 0.10.0
libtpu: 0.0.40
codegen_flags: <defaults>
</compile_context>

<pallas_src>
from functools import partial

import jax
import jax.numpy as jnp
from jax.experimental import pallas as pl
from jax.experimental.pallas import tpu as pltpu

_LANE = 128
_F32 = jnp.float32


def _round_up(x, m):
    return ((x + m - 1) // m) * m


def _row_vmem_bytes(cols, dtype):
    """Padded VMEM bytes per batch row of a streamed block (lanes pad to 128)."""
    return _round_up(max(int(cols), 1), _LANE) * jnp.dtype(dtype).itemsize


def _tile_vmem_bytes(rows, cols, dtype):
    """Padded VMEM bytes of a whole (rows, cols) block for `dtype`."""
    dt = jnp.dtype(dtype)
    pack = max(1, 4 // dt.itemsize)
    return _round_up(max(int(rows), 1), 8 * pack) * _row_vmem_bytes(cols, dtype)


def _sublane_multiple(dtype):
    return 8 * max(1, 4 // jnp.dtype(dtype).itemsize)


def _pick_group(batch, dm1, lane=_LANE):
    """Largest G with G*dm1 <= 128 and batch % G == 0 (G=1 -> unpacked layout)."""
    gmax = max(1, lane // max(dm1, 1))
    for g in range(min(gmax, max(batch, 1)), 0, -1):
        if batch % g == 0:
            return g
    # TODO(synk): for batches with no good divisor, split off a remainder
    # chunk instead of falling all the way back to G=1.
    return 1


def _fvib_loss_kernel(labels_ref, outputs_ref, expand_ref, within_ref, kbig_ref,
                      part_ref, *, d, n_valid, need_mask):
    """One batch tile: packed centered one-hot -> MXU matmul -> partial SSE.

    The grid axis is fully parallel: each step writes its own partial sum, so
    Mosaic may shard batch tiles across both TensorCores on v7x.
    """
    tb, p = outputs_ref.shape
    g = labels_ref.shape[1]

    labels = labels_ref[...].astype(_F32)                        # (tb, G)
    if g == 1:
        # Unpacked layout: the label broadcasts across all d-1 lanes directly.
        lab_lane = labels                                         # (tb, 1)
    else:
        # Packed layout: replicate each group's label across its dm1 lanes via
        # a tiny resident expansion matmul (exact: one nonzero term per lane).
        lab_lane = jnp.dot(labels, expand_ref[...],
                           preferred_element_type=_F32,
                           precision=jax.lax.Precision.HIGHEST)   # (tb, P)

    # Centered one-hot: one_hot(label, d)[:, :-1] - 1/d, laid out lane-dense.
    # label == d-1 never matches a within-class index, exactly like [:, :-1].
    onehot = jnp.where(within_ref[...] == lab_lane, 1.0, 0.0).astype(_F32) - (1.0 / d)

    # h_hat = centered_one_hot @ blockdiag(K.T).
    # TODO(synk): for large dm1 (hundreds+) cast onehot/kbig to bf16 for MXU
    # throughput, or switch to the gather form h_hat = table[label] - colsum/d.
    h_hat = jnp.dot(onehot, kbig_ref[...], preferred_element_type=_F32,
                    precision=jax.lax.Precision.HIGHEST)

    diff = outputs_ref[...].astype(_F32) - h_hat                  # in-kernel cast

    if need_mask:
        # Partial last block (batch not a tile multiple): zero garbage rows
        # BEFORE squaring so NaN/Inf in uninitialized VMEM cannot leak in.
        rows = pl.program_id(0) * tb + jax.lax.broadcasted_iota(jnp.int32, (tb, p), 0)
        diff = jnp.where(rows < n_valid, diff, 0.0)

    part_ref[...] = jnp.sum(diff * diff).reshape(1, 1, 1)


def fvib_loss(outputs, labels, K, *, block_rows=None):
    """loss = mean((outputs - (one_hot(labels, d)[:, :-1] - 1/d) @ K.T)**2)."""
    B, dm1 = outputs.shape
    assert K.shape == (dm1, dm1), (K.shape, outputs.shape)
    d = dm1 + 1

    # ---- lane packing: fold G batch rows into one (up to) 128-lane row -------
    G = _pick_group(B, dm1)
    P = G * dm1
    n_groups = B // G
    outputs_p = outputs.reshape(n_groups, P)          # free row-major reshape
    labels_p = labels.astype(jnp.int32).reshape(n_groups, G)
    # TODO(synk): carry labels as int8/int16 when d is small to cut label HBM
    # traffic further (kept int32 here for conservative Mosaic lowering).

    # Small resident operands, built once in the wrapper.
    col = jnp.arange(P, dtype=jnp.int32)
    within = (col % dm1).astype(_F32).reshape(1, P)                 # lane -> class idx
    expand = (col[None, :] // dm1 ==
              jnp.arange(G, dtype=jnp.int32)[:, None]).astype(_F32)  # (G, P) replicator
    kbig = jnp.kron(jnp.eye(G, dtype=_F32), K.T.astype(_F32))        # block-diag K.T
    # TODO(synk): for very large dm1 tile kbig's output columns with a second
    # grid axis instead of keeping it fully VMEM-resident.

    # ---- VMEM budgeting with padded (sublane, 128-lane) tile footprints ------
    try:
        vmem_cap = int(pltpu.get_tpu_info().vmem_capacity_bytes)
    except Exception:             # unknown -> assume the smallest gen (v7x, 64 MiB)
        vmem_cap = 64 << 20
    vmem_limit = int(min(3 * vmem_cap // 4, 100 << 20))   # ~48 MiB v7x, ~96 MiB v5e/v6e

    resident = 2 * (_tile_vmem_bytes(G, P, _F32) + _tile_vmem_bytes(1, P, _F32)
                    + _tile_vmem_bytes(P, P, _F32))        # assume double-buffered
    per_group = _row_vmem_bytes(P, outputs.dtype) + _row_vmem_bytes(G, jnp.int32)
    stream_budget = max(vmem_limit - resident - (4 << 20), 2 * per_group * 8)

    row_mult = max(_sublane_multiple(outputs.dtype), 8)
    tb = min((4 << 20) // per_group,                  # ~2-4 MiB live per streamed buffer
             stream_budget // (2 * per_group),         # double-buffered, fits the limit
             _round_up(n_groups, row_mult))            # never bigger than the batch
    if block_rows is not None:                         # manual override (tests/tuning)
        tb = min(tb, pl.cdiv(block_rows, G))
    tb = max(row_mult, (tb // row_mult) * row_mult)    # keep sublane-dim legality

    nblocks = pl.cdiv(n_groups, tb)
    need_mask = (nblocks * tb) != n_groups             # partial last block, no jnp.pad

    partials = pl.pallas_call(
        partial(_fvib_loss_kernel, d=d, n_valid=n_groups, need_mask=need_mask),
        out_shape=jax.ShapeDtypeStruct((nblocks, 1, 1), _F32),
        grid=(nblocks,),
        in_specs=[
            pl.BlockSpec((tb, G), lambda i: (i, 0)),    # labels, streamed
            pl.BlockSpec((tb, P), lambda i: (i, 0)),    # outputs, streamed native dtype
            pl.BlockSpec((G, P), lambda i: (0, 0)),     # label replicator, resident
            pl.BlockSpec((1, P), lambda i: (0, 0)),     # lane -> class index, resident
            pl.BlockSpec((P, P), lambda i: (0, 0)),     # block-diag K.T, resident
        ],
        out_specs=pl.BlockSpec((1, 1, 1), lambda i: (i, 0, 0)),  # per-block partial SSE
        compiler_params=pltpu.CompilerParams(
            dimension_semantics=("parallel",),          # lets v7x split blocks over 2 TCs
            vmem_limit_bytes=vmem_limit),
    )(labels_p, outputs_p, expand, within, kbig)

    return jnp.sum(partials) * (1.0 / (B * dm1))


if __name__ == "__main__":
    key = jax.random.PRNGKey(0)
    k_K, k_out, k_lab = jax.random.split(key, 3)

    def reference(outputs, labels, K):
        d = K.shape[0] + 1
        oh = jax.nn.one_hot(labels, d, dtype=jnp.float32)[:, :-1] - 1.0 / d
        h_hat = jnp.matmul(oh, K.T.astype(jnp.float32),
                           precision=jax.lax.Precision.HIGHEST)
        return jnp.mean((outputs.astype(jnp.float32) - h_hat) ** 2)

    # Case 1: packed layout (G = 128 // dm1 = 16), multi-block grid with a
    # partial (masked) last block and parallel per-block partial sums.
    B1, dm1a = 192, 8
    K1 = jax.random.normal(k_K, (dm1a, dm1a), dtype=jnp.float32)
    out1 = jax.random.normal(k_out, (B1, dm1a), dtype=jnp.float32)
    lab1 = jax.random.randint(k_lab, (B1,), 0, dm1a + 1, dtype=jnp.int32)
    loss1 = fvib_loss(out1, lab1, K1, block_rows=64)    # force a multi-block grid
    jax.block_until_ready(loss1)
    ref1 = reference(out1, lab1, K1)
    assert jnp.allclose(loss1, ref1, rtol=1e-4, atol=1e-4), (loss1, ref1)

    # Case 2: unpacked fallback (prime batch -> G = 1), single partial block.
    B2, dm1b = 37, 5
    K2 = jax.random.normal(k_K, (dm1b, dm1b), dtype=jnp.float32)
    out2 = jax.random.normal(k_out, (B2, dm1b), dtype=jnp.float32)
    lab2 = jax.random.randint(k_lab, (B2,), 0, dm1b + 1, dtype=jnp.int32)
    loss2 = fvib_loss(out2, lab2, K2)
    jax.block_until_ready(loss2)
    ref2 = reference(out2, lab2, K2)
    assert jnp.allclose(loss2, ref2, rtol=1e-4, atol=1e-4), (loss2, ref2)

    print("KERNEL_OK")
</pallas_src>

<mosaic_0001>
module attributes {stable_mosaic.version = 11 : i64} {
  func.func @_fvib_loss_kernel(%arg0: i32, %arg1: memref<8x16xi32, #tpu.memory_space<vmem>>, %arg2: memref<8x128xf32, #tpu.memory_space<vmem>>, %arg3: memref<16x128xf32, #tpu.memory_space<vmem>>, %arg4: memref<1x128xf32, #tpu.memory_space<vmem>>, %arg5: memref<128x128xf32, #tpu.memory_space<vmem>>, %arg6: memref<1x1x1xf32, #tpu.memory_space<vmem>>) attributes {dimension_semantics = [#tpu.dimension_semantics<parallel>], iteration_bounds = array<i64: 2>, scalar_prefetch = 0 : i64, scratch_operands = 0 : i64, tpu.core_type = #tpu.core_type<tc>, window_params = [{transform_indices = @transform_0, window_bounds = array<i64: 8, 16>}, {transform_indices = @transform_1, window_bounds = array<i64: 8, 128>}, {pipeline_mode = #tpu.pipeline_mode<synchronous>, transform_indices = @transform_2, window_bounds = array<i64: 16, 128>}, {pipeline_mode = #tpu.pipeline_mode<synchronous>, transform_indices = @transform_3, window_bounds = array<i64: 1, 128>}, {pipeline_mode = #tpu.pipeline_mode<synchronous>, transform_indices = @transform_4, window_bounds = array<i64: 128, 128>}, {transform_indices = @transform_5, window_bounds = array<i64: 1, 1, 1>}]} {
    %c0 = arith.constant 0 : index
    %c0_0 = arith.constant 0 : index
    %0 = vector.load %arg1[%c0, %c0_0] : memref<8x16xi32, #tpu.memory_space<vmem>>, vector<8x16xi32>
    %1 = arith.sitofp %0 : vector<8x16xi32> to vector<8x16xf32>
    %c0_1 = arith.constant 0 : index
    %c0_2 = arith.constant 0 : index
    %2 = vector.load %arg3[%c0_1, %c0_2] : memref<16x128xf32, #tpu.memory_space<vmem>>, vector<16x128xf32>
    %cst = arith.constant dense<0.000000e+00> : vector<8x128xf32>
    %3 = tpu.matmul %1, %2, %cst {dimension_numbers = #tpu.dot_dimension_numbers<[1], [0], [0], [1], [0, 0, 1, 1], [], []>, precision = #tpu.contract_precision<fp32>} : vector<8x16xf32>, vector<16x128xf32>, vector<8x128xf32> -> vector<8x128xf32>
    %c0_3 = arith.constant 0 : index
    %c0_4 = arith.constant 0 : index
    %4 = vector.load %arg4[%c0_3, %c0_4] : memref<1x128xf32, #tpu.memory_space<vmem>>, vector<1x128xf32>
    %5 = vector.broadcast %4 : vector<1x128xf32> to vector<8x128xf32>
    %6 = arith.cmpf oeq, %5, %3 : vector<8x128xf32>
    %cst_5 = arith.constant 1.000000e+00 : f32
    %cst_6 = arith.constant 0.000000e+00 : f32
    %7 = vector.broadcast %cst_5 : f32 to vector<8x128xf32>
    %8 = vector.broadcast %cst_6 : f32 to vector<8x128xf32>
    %9 = arith.select %6, %7, %8 : vector<8x128xi1>, vector<8x128xf32>
    %cst_7 = arith.constant 0.111111112 : f32
    %10 = vector.broadcast %cst_7 : f32 to vector<8x128xf32>
    %11 = arith.subf %9, %10 : vector<8x128xf32>
    %c0_8 = arith.constant 0 : index
    %c0_9 = arith.constant 0 : index
    %12 = vector.load %arg5[%c0_8, %c0_9] : memref<128x128xf32, #tpu.memory_space<vmem>>, vector<128x128xf32>
    %cst_10 = arith.constant dense<0.000000e+00> : vector<8x128xf32>
    %13 = tpu.matmul %11, %12, %cst_10 {dimension_numbers = #tpu.dot_dimension_numbers<[1], [0], [0], [1], [0, 0, 1, 1], [], []>, precision = #tpu.contract_precision<fp32>} : vector<8x128xf32>, vector<128x128xf32>, vector<8x128xf32> -> vector<8x128xf32>
    %c0_11 = arith.constant 0 : index
    %c0_12 = arith.constant 0 : index
    %14 = vector.load %arg2[%c0_11, %c0_12] : memref<8x128xf32, #tpu.memory_space<vmem>>, vector<8x128xf32>
    %15 = arith.subf %14, %13 : vector<8x128xf32>
    %c8_i32 = arith.constant 8 : i32
    %16 = arith.muli %arg0, %c8_i32 : i32
    %17 = tpu.iota {dimensions = array<i32: 0>} : vector<8x128xi32>
    %18 = vector.broadcast %16 : i32 to vector<8x128xi32>
    %19 = arith.addi %18, %17 : vector<8x128xi32>
    %c12_i32 = arith.constant 12 : i32
    %20 = vector.broadcast %c12_i32 : i32 to vector<8x128xi32>
    %21 = arith.cmpi slt, %19, %20 : vector<8x128xi32>
    %cst_13 = arith.constant 0.000000e+00 : f32
    %22 = vector.broadcast %cst_13 : f32 to vector<8x128xf32>
    %23 = arith.select %21, %15, %22 : vector<8x128xi1>, vector<8x128xf32>
    %24 = arith.mulf %23, %23 : vector<8x128xf32>
    %25 = vector.shape_cast %24 : vector<8x128xf32> to vector<1x8x128xf32>
    %cst_14 = arith.constant dense<0.000000e+00> : vector<1xf32>
    %26 = vector.multi_reduction <add>, %25, %cst_14 [1, 2] : vector<1x8x128xf32> to vector<1xf32>
    %27 = vector.shape_cast %26 : vector<1xf32> to vector<1x1x1xf32>
    %28 = vector.extract %27[0, 0, 0] : f32 from vector<1x1x1xf32>
    %29 = vector.broadcast %28 : f32 to vector<1x1x1xf32>
    %c0_15 = arith.constant 0 : index
    %c0_16 = arith.constant 0 : index
    %c0_17 = arith.constant 0 : index
    %30 = vector.load %arg6[%c0_15, %c0_16, %c0_17] : memref<1x1x1xf32, #tpu.memory_space<vmem>>, vector<1x1x1xf32>
    tpu.vector_store %arg6[%c0_15, %c0_16, %c0_17], %29 {strides = array<i32>} : memref<1x1x1xf32, #tpu.memory_space<vmem>>, vector<1x1x1xf32>,
    return
  }
  func.func @transform_0(%arg0: i32) -> (i32, i32) {
    %c0_i32 = arith.constant 0 : i32
    %c0_i32_0 = arith.constant 0 : i32
    return %arg0, %c0_i32 : i32, i32
  }
  func.func @transform_1(%arg0: i32) -> (i32, i32) {
    %c0_i32 = arith.constant 0 : i32
    %c0_i32_0 = arith.constant 0 : i32
    return %arg0, %c0_i32 : i32, i32
  }
  func.func @transform_2(%arg0: i32) -> (i32, i32) {
    %c0_i32 = arith.constant 0 : i32
    %c0_i32_0 = arith.constant 0 : i32
    %c0_i32_1 = arith.constant 0 : i32
    return %c0_i32, %c0_i32_0 : i32, i32
  }
  func.func @transform_3(%arg0: i32) -> (i32, i32) {
    %c0_i32 = arith.constant 0 : i32
    %c0_i32_0 = arith.constant 0 : i32
    %c0_i32_1 = arith.constant 0 : i32
    return %c0_i32, %c0_i32_0 : i32, i32
  }
  func.func @transform_4(%arg0: i32) -> (i32, i32) {
    %c0_i32 = arith.constant 0 : i32
    %c0_i32_0 = arith.constant 0 : i32
    %c0_i32_1 = arith.constant 0 : i32
    return %c0_i32, %c0_i32_0 : i32, i32
  }
  func.func @transform_5(%arg0: i32) -> (i32, i32, i32) {
    %c0_i32 = arith.constant 0 : i32
    %c0_i32_0 = arith.constant 0 : i32
    %c0_i32_1 = arith.constant 0 : i32
    return %arg0, %c0_i32, %c0_i32_0 : i32, i32, i32
  }
}

</mosaic_0001>

<bundles_post_ra>
// kernel: tpu_custom_call.1
= control target key start
LH: loop header
LB: loop body
LE: loop exit
PB: predicated region body
PF: predicated region fallthrough
CT: control target
= control target key end

     0   :  { %10 = vsyncpa [#allocation3], 0  ;;  %s1653_s0 = inlined_call_operand.hbm [shape: s32[12,16], index: 0, kind: input, shape index: {}]   ;;  %s1654_s1 = inlined_call_operand.hbm [shape: f32[12,128], index: 1, kind: input, shape index: {}]   ;;  %s1655_s2 = inlined_call_operand.hbm [shape: f32[16,128], index: 2, kind: input, shape index: {}]   ;;  %s1656_s3 = inlined_call_operand.vmem [shape: f32[1,128], index: 3, kind: input, shape index: {}]   ;;  %s1657_s4 = inlined_call_operand.hbm [shape: f32[128,128], index: 4, kind: input, shape index: {}]   ;;  %s1658_s5 = inlined_call_operand.vmem [shape: f32[2,1,1], index: 5, kind: output, shape index: {}]  }
   0x1   :  { %12 = vsyncpa [#allocation3 + $0x1], 0 }
   0x2   :  { %13 = vsyncpa [#allocation5], 0 }
   0x3   :  { %15 = vsyncpa [#allocation5 + $0x1], 0 }
   0x4   :  { %16 = vsyncpa [#allocation8], 0  ;;  %s1258_s18 = smov 0   ;;  %s1260_s19 = smov 0  }
   0x5   :  { %s1262_s20 = smov 0   ;;  %s1264_s21 = smov 0  }
   0x6 LB: > { %s179_s24 = sshll.u32 %s1655_s2, 4  ;;  %s1282_s25 = sadd.s32 4294967295, %s1221_s21   ;;  %s1221_s21 = sphi %s1264_s21, %s1665_s21   ;;  %s1217_s20 = sphi %s1262_s20, %s1664_s20   ;;  %s1213_s19 = sphi %s1260_s19, %s1663_s19   ;;  %s1209_s18 = sphi %s1258_s18, %s1662_s18   ;;  %s180_s24 = int_to_ptr.hbm [resolvable:$true] %s179_s24 }
   0x7   : > { %p967_p0 = scmp.ge.s32.totalorder %s1221_s21, 1  ;;  %p43_p1 = scmp.eq.s32.totalorder %s1282_s25, 0 }
   0x8   : > { %p168_p2 = scmp.lt.s32.totalorder %s1221_s21, 3  ;;  %s1223_s27 = smov [#allocation6]  }
   0x9   : > { %s181_s28 = sshll.u32 %s1223_s27, 4  ;;  %s196_s6 = sshll.u32 %s1657_s4, 4  ;;  %s182_s28 = int_to_ptr.vmem [resolvable:$true] %s181_s28  ;;  %s197_s6 = int_to_ptr.hbm [resolvable:$true] %s196_s6 }
   0xa   : > { %p1287_p3 = pnand %p967_p0, %p168_p2  ;;  %s1224_s7 = smov [#allocation7]  }
   0xb   : > { %s198_s8 = sshll.u32 %s1224_s7, 4  ;;  %s1225_s9 = smov 128   ;;  %s199_s8 = int_to_ptr.vmem [resolvable:$true] %s198_s8 }
   0xc   : > { %p998_p4 = pneg %p1287_p3  ;;  %s1226_s10 = smov 8  }
   0xd   : > { %s1299_s11 = sadd.s32 1, %s1221_s21   ;;  %s29_s12 = sadd.s32 1, %s1217_s20 }
   0xe   : > { %p999_p5 = pnand %p998_p4, %p43_p1  ;;  %s26_s13 = ssub.s32 %s1221_s21, %s1299_s11 }
   0xf   : > { %p36_p6 = scmp.ne.s32.totalorder %s1217_s20, %s1213_s19  ;;  %p27_p7 = scmp.eq.s32.totalorder %s26_s13, 0 }
  0x10   : > { %1001 = dma.hbm_to_vmem [thread:$0]  (!%p999_p5), %s180_s24, 256, %s182_s28, [#allocation5], %s1225_s9, %s1225_s9, %s1226_s10  }
  0x11   : > { %1004 = dma.hbm_to_vmem [thread:$0]  (!%p999_p5), %s197_s6, 2048, %s199_s8, [#allocation8], %s1225_s9, %s1225_s9, %s1226_s10  }
  0x12   : > { %p37_p8 = scmp.eq.s32.totalorder %s1221_s21, 0  ;;  %p42_p9 = scmp.ne.s32.totalorder %s1213_s19, %s1209_s18 }
  0x13   : > { %p1014_p10 = scmp.lt.s32.totalorder %s1221_s21, 2  ;;  %s212_s16 = sand.u32 1, %s1217_s20  }
  0x14   : > { %s1311_s14 = scalar_select %p27_p7, %s1217_s20, %s29_s12  }
  0x15   : > { %p38_p11 = por %p37_p8, %p36_p6  ;;  %p1315_p12 = por %p43_p1, %p42_p9 }
  0x16   : > { %s972_s17 = sshll.u32 %s1221_s21, 3  ;;  %s971_s22 = sshll.u32 %s212_s16, 3 }
  0x17   : > { %s220_s27 = scalar_lea.hbm %s1653_s0, %s972_s17  ;;  %s216_s29 = scalar_lea.vmem [#allocation2], %s971_s22 }
  0x18   : > { %s222_s28 = sshll.u32 %s220_s27, 4  ;;  %s224_s18 = sshll.u32 %s216_s29, 4  ;;  %s223_s28 = int_to_ptr.hbm [resolvable:$true] %s222_s28  ;;  %s225_s18 = int_to_ptr.vmem [resolvable:$true] %s224_s18 }
  0x19   : > { %p1326_p13 = pnand %p1014_p10, %p38_p11  ;;  %s239_s8 = scalar_lea.hbm %s1654_s1, %s972_s17 }
  0x1a   : > { %s231_s9 = sand.u32 1, %s1221_s21   ;;  %s213_s10 = scalar_lea.sflag [#allocation3], %s212_s16 }
  0x1b   : > { %s1115_s12 = sshra.s32 %s223_s28, 4  ;;  %p1119_p2 = pneg %p1326_p13  ;;  %s1116_s12 = int_to_ptr.hbm [resolvable:$true] %s1115_s12 }
  0x1c   : > { %s1117_s13 = scalar_lea.hbm %s1116_s12, 8  ;;  %s1122_s27 = scalar_lea.hbm %s1653_s0, 16 }
  0x1d   : > { %p1118_p0 = scmp.ne.s32.totalorder %s1116_s12, %s1117_s13  ;;  %p1123_p6 = scmp.lt.s32.totalorder %s1116_s12, %s1653_s0 }
  0x1e   : > { %p1124_p7 = scmp.lt.s32.totalorder %s1122_s27, %s1117_s13 }
  0x1f   : > { %p1120_p4 = pnand %p1119_p2, %p1118_p0 }
  0x20   : > { %p1125_p8 = por %p1124_p7, %p1123_p6 }
  0x21   : > { %p1121_p5 = pneg %p1120_p4 }
  0x23   : > { %p1126_p9 = pnand %p1125_p8, %p1121_p5 }
  0x25   : > { %1129 = shalt.err (!%p1126_p9)
}
  0x26   : > { %1008 = dma.hbm_to_vmem [thread:$0]  (!%p1326_p13), %s223_s28, 128, %s225_s18, %s213_s10  }
  0x27   : > { %s241_s21 = sshll.u32 %s239_s8, 4  ;;  %s235_s16 = scalar_lea.vmem [#allocation4], %s971_s22  ;;  %s242_s21 = int_to_ptr.hbm [resolvable:$true] %s241_s21 }
  0x28   : > { %s243_s17 = sshll.u32 %s235_s16, 4  ;;  %s232_s7 = scalar_lea.sflag [#allocation5], %s231_s9  ;;  %s244_s17 = int_to_ptr.vmem [resolvable:$true] %s243_s17 }
  0x29   : > { %s1145_s23 = sshra.s32 %s242_s21, 4  ;;  %s1152_s27 = scalar_lea.hbm %s1654_s1, 16  ;;  %s1146_s23 = int_to_ptr.hbm [resolvable:$true] %s1145_s23 }
  0x2a   : > { %s1147_s24 = scalar_lea.hbm %s1146_s23, 8  ;;  %p1153_p4 = scmp.lt.s32.totalorder %s1146_s23, %s1654_s1 }
  0x2b   : > { %p1148_p10 = scmp.ne.s32.totalorder %s1146_s23, %s1147_s24  ;;  %p1154_p5 = scmp.lt.s32.totalorder %s1152_s27, %s1147_s24 }
  0x2d   : > { %p1150_p11 = pnand %p1148_p10, %p1119_p2  ;;  %p1155_p6 = por %p1154_p5, %p1153_p4 }
  0x2f   : > { %p1151_p0 = pneg %p1150_p11 }
  0x31   : > { %p1156_p7 = pnand %p1155_p6, %p1151_p0 }
  0x33   : > { %1159 = shalt.err (!%p1156_p7)
}
  0x34   : > { %1011 = dma.hbm_to_vmem [thread:$0]  (!%p1326_p13), %s242_s21, 128, %s244_s17, %s232_s7  }
  0x35   : > { %252 = sbr.rel (%p1287_p3) target bundleno = 570 (0x23a), region = 40  ;;  %s254_s22 = sand.u32 (!%p1287_p3), 1, %s1213_s19  }
  0x36   : > { %s1361_s18 = sshll.u32 (!%p1287_p3), %s254_s22, 3  ;;  %s255_s8 = scalar_lea.sflag (!%p1287_p3), [#allocation3], %s254_s22 }
  0x37   : > { %s258_s9 = scalar_lea.vmem (!%p1287_p3), [#allocation2], %s1361_s18 }
  0x3a   : > { %1192 = dma.done.wait (%p1315_p12), %s255_s8, 128  }
  0x3b   : > { %1194 = vsyncadd (%p1315_p12), %s255_s8, 4294967168  ;;  %s264_s30 = sand.u32 1, %s1282_s25   ;;  %s268_s26 = scalar_lea.vmem [#allocation4], %s1361_s18 }
  0x3c   : > { %s265_s10 = scalar_lea.sflag [#allocation5], %s264_s30 }
  0x3d   : > { %1196 = dma.done.wait (%p1315_p12), %s265_s10, 128  }
  0x3e   : > { %1198 = vsyncadd (%p1315_p12), %s265_s10, 4294967168 }
  0x3f   : > { %1200 = dma.done.wait (%p43_p1), [#allocation5], 256  }
  0x40   : > { %1202 = vsyncadd (%p43_p1), [#allocation5], 4294967040 }
  0x41   : > { %1204 = dma.done.wait (%p43_p1), [#allocation8], 2048  }
  0x42   : > { %1206 = vsyncadd (%p43_p1), [#allocation8], 4294965248  ;;  %v315_v0 = vld [vmem:[#allocation6 + $0x8] sm:$0xff]  ;;  %v314_v1 = vld [vmem:[#allocation6] sm:$0xff]  ;;  %vm316_vm0 = vcmask 130048   ;;  %s981_s21 = sshll.u32 %s1282_s25, 3 }
  0x43   : > { %v312_v2 = vld [vmem:[%s258_s9] sm:$0xff]  ;;  %v1382_v3 = vand.u32 4294901760, %v315_v0  ;;  %v1384_v4 = vand.u32 4294901760, %v314_v1  ;;  %v499_v8 = vld [vmem:[#allocation7 + $0x68] sm:$0xff]  ;;  %v498_v12 = vld [vmem:[#allocation7 + $0x60] sm:$0xff]  ;;  %p309_p1 = scmp.lt.s32.totalorder %s1282_s25, 1 }
  0x44   : > { %v313_v5 = vcvt.s32.f32 %v312_v2  ;;  %v501_v6 = vld [vmem:[#allocation7 + $0x78] sm:$0xff]  ;;  %v500_v7 = vld [vmem:[#allocation7 + $0x70] sm:$0xff]  ;;  %v1390_v11 = vand.u32 4294901760, %v499_v8  ;;  %v1399_v17 = vand.u32 4294901760, %v498_v12  ;;  %v495_v38 = vld [vmem:[#allocation7 + $0x48] sm:$0xff]  ;;  %vm863_vm3 = vcmask 0  }
  0x45   : > { %v1386_v9 = vand.u32 4294901760, %v501_v6  ;;  %v1388_v10 = vand.u32 4294901760, %v500_v7  ;;  %v497_v13 = vld [vmem:[#allocation7 + $0x58] sm:$0xff]  ;;  %335 = vmatpush.msra.mxu0 %v1382_v3  ;;  %v1394_v14 = vsub.f32 %v315_v0, %v1382_v3  ;;  %v1397_v15 = vsub.f32 %v314_v1, %v1384_v4  ;;  %v496_v37 = vld [vmem:[#allocation7 + $0x50] sm:$0xff]  ;;  %v494_v41 = vld [vmem:[#allocation7 + $0x40] sm:$0xff]  ;;  %s1667_s25 = smov (!%p309_p1, %s1282_s25), 1 }
  0x46   : > { %v318_v16 = vsel %vm316_vm0, %v313_v5, 0  ;;  %v1410_v21 = vsub.f32 %v499_v8, %v1390_v11  ;;  %v1417_v24 = vsub.f32 %v498_v12, %v1399_v17  ;;  %v1419_v25 = vand.u32 4294901760, %v497_v13  ;;  %v493_v42 = vld [vmem:[#allocation7 + $0x38] sm:$0xff]  ;;  %v492_v43 = vld [vmem:[#allocation7 + $0x30] sm:$0xff]  ;;  %v491_v56 = vld [vmem:[#allocation7 + $0x28] sm:$0xff]  ;;  %s311_s7 = scalar_lea.vmem %s1658_s5, %s1667_s25 }
  0x47   : > { %v1401_v18 = vand.u32 4294901760, %v318_v16  ;;  %v1404_v19 = vsub.f32 %v501_v6, %v1386_v9  ;;  %v1407_v20 = vsub.f32 %v500_v7, %v1388_v10  ;;  %503 = vmatpush.msra.mxu2 %v1386_v9  ;;  %v363_v22 = vand.u32 4294901760, %v1394_v14  ;;  %337 = vmatpush.msra.mxu0 %v1384_v4  ;;  %v490_v62 = vld [vmem:[#allocation7 + $0x20] sm:$0xff]  ;;  %v489_v7 = vld [vmem:[#allocation7 + $0x18] sm:$0xff] }
  0x48   : > { %v369_v23 = vand.u32 4294901760, %v1397_v15  ;;  %v557_v29 = vand.u32 4294901760, %v1410_v21  ;;  %v563_v32 = vand.u32 4294901760, %v1417_v24  ;;  %v1433_v33 = vsub.f32 %v497_v13, %v1419_v25 }
  0x49   : > { %v1422_v26 = vsub.f32 %v318_v16, %v1401_v18  ;;  %394 = vmatpush.msrb.mxu0 %v1394_v14  ;;  %v545_v27 = vand.u32 4294901760, %v1404_v19  ;;  %v551_v28 = vand.u32 4294901760, %v1407_v20  ;;  %505 = vmatpush.msra.mxu2 %v1388_v10  ;;  %v364_v30 = vsub.f32 %v1394_v14, %v363_v22 }
  0x4a   : > { %v370_v31 = vsub.f32 %v1397_v15, %v369_v23  ;;  %v558_v46 = vsub.f32 %v1410_v21, %v557_v29  ;;  %v569_v47 = vand.u32 4294901760, %v1433_v33  ;;  %v564_v49 = vsub.f32 %v1417_v24, %v563_v32 }
  0x4b   : > { %v340_v34 = vand.u32 4294901760, %v1422_v26  ;;  %397 = vmatpush.msrb.mxu0 %v1397_v15  ;;  %v546_v35 = vsub.f32 %v1404_v19, %v545_v27  ;;  %v552_v36 = vsub.f32 %v1407_v20, %v551_v28  ;;  %507 = vmatpush.msra.mxu2 %v1390_v11  ;;  %v365_v39 = vand.u32 4294901760, %v364_v30  ;;  %v488_v15 = vld [vmem:[#allocation7 + $0x10] sm:$0xff] }
  0x4c   : > { %v371_v40 = vand.u32 4294901760, %v370_v31  ;;  %v1455_v50 = vand.u32 4294901760, %v496_v37  ;;  %v1457_v51 = vand.u32 4294901760, %v495_v38  ;;  %v1459_v53 = vand.u32 4294901760, %v494_v41 }
  0x4d   : > { %v341_v44 = vsub.f32 %v1422_v26, %v340_v34  ;;  %v547_v45 = vand.u32 4294901760, %v546_v35  ;;  %509 = vmatpush.msra.mxu2 %v1399_v17  ;;  %366 = vmatpush.msra.mxu1 %v365_v39  ;;  %v553_v48 = vand.u32 4294901760, %v552_v36  ;;  %v1462_v54 = vand.u32 4294901760, %v493_v42 }
  0x4e   : > { %v1464_v55 = vand.u32 4294901760, %v492_v43  ;;  %v1467_v57 = vsub.f32 %v496_v37, %v1455_v50  ;;  %v1470_v58 = vsub.f32 %v495_v38, %v1457_v51  ;;  %v559_v59 = vand.u32 4294901760, %v558_v46 }
  0x4f   : > { %v342_v52 = vand.u32 4294901760, %v341_v44  ;;  %548 = vmatpush.msra.mxu3 %v547_v45  ;;  %511 = vmatpush.msra.mxu2 %v1419_v25  ;;  %v570_v60 = vsub.f32 %v1433_v33, %v569_v47  ;;  %v1477_v61 = vsub.f32 %v494_v41, %v1459_v53  ;;  %v1483_v1 = vsub.f32 %v493_v42, %v1462_v54 }
  0x50   : > { %372 = vmatpush.msra.mxu1 %v371_v40  ;;  %v575_v63 = vand.u32 4294901760, %v1467_v57  ;;  %v581_v0 = vand.u32 4294901760, %v1470_v58  ;;  %v1485_v2 = vand.u32 4294901760, %v491_v56  ;;  %v565_v5 = vand.u32 4294901760, %v564_v49 }
  0x51   : > { %343 = vmatmul.f32.vlgmr.msra.gmra.mxu0 %v342_v52  ;;  %374 = vmatmul.f32.vlgmr.msra.gmra.mxu1 %v1401_v18  ;;  %v1489_v6 = vsub.f32 %v492_v43, %v1464_v55  ;;  %v587_v12 = vand.u32 4294901760, %v1477_v61  ;;  %v1496_v13 = vand.u32 4294901760, %v490_v62  ;;  %v571_v14 = vand.u32 4294901760, %v570_v60 }
  0x52   : > { %419 = vmatpush.msrb.mxu1 %v1382_v3  ;;  %446 = vmatpush.msra.mxu0 %v363_v22  ;;  %v576_v8 = vsub.f32 %v1467_v57, %v575_v63  ;;  %v582_v16 = vsub.f32 %v1470_v58, %v581_v0  ;;  %v593_v22 = vand.u32 4294901760, %v1483_v1  ;;  %v1507_v30 = vand.u32 4294901760, %v489_v7 }
  0x53   : > { %554 = vmatpush.msra.mxu3 %v553_v48  ;;  %513 = vmatpush.msra.mxu2 %v1455_v50  ;;  %v588_v35 = vsub.f32 %v1477_v61, %v587_v12  ;;  %v1516_v36 = vsub.f32 %v490_v62, %v1496_v13  ;;  %v1518_v37 = vand.u32 4294901760, %v488_v15 }
  0x54   : > { %421 = vmatpush.msrb.mxu1 %v1384_v4  ;;  %450 = vmatpush.msra.mxu0 %v369_v23  ;;  %v1505_v23 = vsub.f32 %v491_v56, %v1485_v2  ;;  %v577_v31 = vand.u32 4294901760, %v576_v8  ;;  %v594_v38 = vsub.f32 %v1483_v1, %v593_v22  ;;  %v1529_v40 = vsub.f32 %v489_v7, %v1507_v30  ;;  %v486_v8 = vld [vmem:[#allocation7] sm:$0xff] }
  0x55   : > { %560 = vmatpush.msra.mxu3 %v559_v59  ;;  %515 = vmatpush.msra.mxu2 %v1457_v51  ;;  %v611_v41 = vand.u32 4294901760, %v1516_v36  ;;  %v1539_v42 = vsub.f32 %v488_v15, %v1518_v37  ;;  %v532_v15 = vand.u32 4294901760, %v486_v8 }
  0x56   : > { %471 = vmatpush.msra.mxu1 %v1382_v3  ;;  %v599_v3 = vand.u32 4294901760, %v1489_v6  ;;  %v605_v39 = vand.u32 4294901760, %v1505_v23  ;;  %v595_v43 = vand.u32 4294901760, %v594_v38  ;;  %v617_v45 = vand.u32 4294901760, %v1529_v40 }
  0x57   : > { %566 = vmatpush.msra.mxu3 %v565_v5  ;;  %517 = vmatpush.msra.mxu2 %v1459_v53  ;;  %v612_v48 = vsub.f32 %v1516_v36, %v611_v41  ;;  %v623_v49 = vand.u32 4294901760, %v1539_v42  ;;  %v487_v5 = vld [vmem:[#allocation7 + $0x8] sm:$0xff] }
  0x58   : > { %473 = vmatpush.msra.mxu1 %v1384_v4  ;;  %v583_v4 = vand.u32 4294901760, %v582_v16  ;;  %v606_v44 = vsub.f32 %v1505_v23, %v605_v39  ;;  %v618_v56 = vsub.f32 %v1529_v40, %v617_v45  ;;  %v530_v7 = vand.u32 4294901760, %v487_v5 }
  0x59   : > { %400 = vmatmul.f32.vlgmr.msrb.gmra.mxu0 %v1422_v26  ;;  %425 = vmatmul.f32.vlgmr.msrb.gmra.mxu1 %v340_v34  ;;  %v589_v26 = vand.u32 4294901760, %v588_v35  ;;  %v600_v34 = vsub.f32 %v1489_v6, %v599_v3  ;;  %v613_v59 = vand.u32 4294901760, %v612_v48  ;;  %v624_v60 = vsub.f32 %v1539_v42, %v623_v49 }
  0x5a   : > { %572 = vmatpush.msra.mxu3 %v571_v14  ;;  %519 = vmatpush.msra.mxu2 %v1462_v54  ;;  %v607_v52 = vand.u32 4294901760, %v606_v44  ;;  %v628_v14 = vsub.f32 %v487_v5, %v530_v7 }
  0x5b   : > { %646 = vmatpush.msrb.mxu0 %v1404_v19  ;;  %699 = vmatpush.msrb.mxu1 %v1386_v9  ;;  %v601_v46 = vand.u32 4294901760, %v600_v34  ;;  %v625_v62 = vand.u32 4294901760, %v624_v60 }
  0x5c   : > { %578 = vmatpush.msra.mxu3 %v577_v31  ;;  %521 = vmatpush.msra.mxu2 %v1464_v55  ;;  %v629_v16 = vand.u32 4294901760, %v628_v14  ;;  %v634_v31 = vsub.f32 %v486_v8, %v532_v15 }
  0x5d   : > { %649 = vmatpush.msrb.mxu0 %v1407_v20  ;;  %701 = vmatpush.msrb.mxu1 %v1388_v10 }
  0x5e   : > { %584 = vmatpush.msra.mxu3 %v583_v4  ;;  %523 = vmatpush.msra.mxu2 %v1485_v2  ;;  %v630_v35 = vsub.f32 %v628_v14, %v629_v16  ;;  %v635_v4 = vand.u32 4294901760, %v634_v31 }
  0x5f   : > { %652 = vmatpush.msrb.mxu0 %v1410_v21  ;;  %703 = vmatpush.msrb.mxu1 %v1390_v11 }
  0x60   : > { %590 = vmatpush.msra.mxu3 %v589_v26  ;;  %525 = vmatpush.msra.mxu2 %v1496_v13  ;;  %v631_v38 = vand.u32 4294901760, %v630_v35  ;;  %v636_v26 = vsub.f32 %v634_v31, %v635_v4 }
  0x61   : > { %452 = vmatmul.f32.vlgmr.msra.gmra.mxu0 %v1401_v18  ;;  %475 = vmatmul.f32.vlgmr.msra.gmra.mxu1 %v1401_v18  ;;  %v619_v18 = vand.u32 4294901760, %v618_v56 }
  0x62   : > { %596 = vmatpush.msra.mxu3 %v595_v43  ;;  %655 = vmatpush.msrb.mxu0 %v1417_v24  ;;  %v637_v34 = vand.u32 4294901760, %v636_v26 }
  0x63   : > { %527 = vmatpush.msra.mxu2 %v1507_v30  ;;  %705 = vmatpush.msrb.mxu1 %v1399_v17 }
  0x64   : > { %602 = vmatpush.msra.mxu3 %v601_v46  ;;  %658 = vmatpush.msrb.mxu0 %v1433_v33 }
  0x65   : > { %529 = vmatpush.msra.mxu2 %v1518_v37  ;;  %707 = vmatpush.msrb.mxu1 %v1419_v25 }
  0x66   : > { %608 = vmatpush.msra.mxu3 %v607_v52  ;;  %661 = vmatpush.msrb.mxu0 %v1467_v57 }
  0x67   : > { %709 = vmatpush.msrb.mxu1 %v1455_v50  ;;  %531 = vmatpush.msra.mxu2 %v530_v7 }
  0x68   : > { %614 = vmatpush.msra.mxu3 %v613_v59  ;;  %664 = vmatpush.msrb.mxu0 %v1470_v58 }
  0x69   : > { %711 = vmatpush.msrb.mxu1 %v1457_v51  ;;  %533 = vmatpush.msra.mxu2 %v532_v15 }
  0x6a   : > { %620 = vmatpush.msra.mxu3 %v619_v18  ;;  %667 = vmatpush.msrb.mxu0 %v1477_v61  ;;  %v846_v61 = vlaneseq }
  0x6b   : > { %713 = vmatpush.msrb.mxu1 %v1459_v53  ;;  %740 = vmatpush.msrb.mxu2 %v545_v27 }
  0x6c   : > { %626 = vmatpush.msra.mxu3 %v625_v62  ;;  %670 = vmatpush.msrb.mxu0 %v1483_v1 }
  0x6d   : > { %715 = vmatpush.msrb.mxu1 %v1462_v54  ;;  %744 = vmatpush.msrb.mxu2 %v551_v28  ;;  %v1054_v28 = vld [vmem:[%s1656_s3] ss:$0 sm:$0xff] }
  0x6e   : > { %673 = vmatpush.msrb.mxu0 %v1489_v6  ;;  %632 = vmatpush.msra.mxu3 %v631_v38  ;;  %v848_v6 = vstv %s981_s21 }
  0x6f   : > { %717 = vmatpush.msrb.mxu1 %v1464_v55  ;;  %748 = vmatpush.msrb.mxu2 %v557_v29 }
  0x70   : > { %676 = vmatpush.msrb.mxu0 %v1505_v23  ;;  %638 = vmatpush.msra.mxu3 %v637_v34 }
  0x71   : > { %719 = vmatpush.msrb.mxu1 %v1485_v2  ;;  %752 = vmatpush.msrb.mxu2 %v563_v32  ;;  %v1227_v32 = vmov 0.0  }
  0x72   : > { %679 = vmatpush.msrb.mxu0 %v1516_v36  ;;  %807 = vmatpush.msrb.mxu3 %v1386_v9  ;;  %v843_v36 = vld [vmem:[%s268_s26] sm:$0xff] }
  0x73   : > { %721 = vmatpush.msrb.mxu1 %v1496_v13  ;;  %756 = vmatpush.msrb.mxu2 %v569_v47 }
  0x74   : > { %682 = vmatpush.msrb.mxu0 %v1529_v40  ;;  %809 = vmatpush.msrb.mxu3 %v1388_v10 }
  0x75   : > { %723 = vmatpush.msrb.mxu1 %v1507_v30  ;;  %760 = vmatpush.msrb.mxu2 %v575_v63 }
  0x76   : > { %685 = vmatpush.msrb.mxu0 %v1539_v42  ;;  %811 = vmatpush.msrb.mxu3 %v1390_v11 }
  0x77   : > { %725 = vmatpush.msrb.mxu1 %v1518_v37  ;;  %764 = vmatpush.msrb.mxu2 %v581_v0 }
  0x78   : > { %688 = vmatpush.msrb.mxu0 %v628_v14  ;;  %813 = vmatpush.msrb.mxu3 %v1399_v17 }
  0x79   : > { %727 = vmatpush.msrb.mxu1 %v530_v7  ;;  %768 = vmatpush.msrb.mxu2 %v587_v12 }
  0x7a   : > { %691 = vmatpush.msrb.mxu0 %v634_v31  ;;  %815 = vmatpush.msrb.mxu3 %v1419_v25 }
  0x7b   : > { %729 = vmatpush.msrb.mxu1 %v532_v15  ;;  %772 = vmatpush.msrb.mxu2 %v593_v22 }
  0x7c   : > { %817 = vmatpush.msrb.mxu3 %v1455_v50 }
  0x7d   : > { %776 = vmatpush.msrb.mxu2 %v599_v3 }
  0x7e   : > { %819 = vmatpush.msrb.mxu3 %v1457_v51 }
  0x7f   : > { %780 = vmatpush.msrb.mxu2 %v605_v39 }
  0x80   : > { %821 = vmatpush.msrb.mxu3 %v1459_v53 }
  0x81   : > { %784 = vmatpush.msrb.mxu2 %v611_v41 }
  0x82   : > { %823 = vmatpush.msrb.mxu3 %v1462_v54 }
  0x83   : > { %788 = vmatpush.msrb.mxu2 %v617_v45 }
  0x84   : > { %825 = vmatpush.msrb.mxu3 %v1464_v55 }
  0x85   : > { %792 = vmatpush.msrb.mxu2 %v623_v49 }
  0x86   : > { %827 = vmatpush.msrb.mxu3 %v1485_v2  ;;  %v847_v2 = vshrl.u32 %v846_v61, 7 }
  0x87   : > { %796 = vmatpush.msrb.mxu2 %v629_v16 }
  0x88   : > { %829 = vmatpush.msrb.mxu3 %v1496_v13  ;;  %v849_v23 = vadd.s32 %v848_v6, %v847_v2 }
  0x89   : > { %800 = vmatpush.msrb.mxu2 %v635_v4 }
  0x8a   : > { %831 = vmatpush.msrb.mxu3 %v1507_v30  ;;  %vm850_vm2 = vcmp.lt.s32.totalorder %v849_v23, 12 }
  0x8c   : > { %833 = vmatpush.msrb.mxu3 %v1518_v37 }
  0x8e   : > { %835 = vmatpush.msrb.mxu3 %v530_v7 }
  0x90   : > { %837 = vmatpush.msrb.mxu3 %v532_v15 }
  0xce   : > { %v344_v9 = vpop.f32.mrf.mxu0  ;;  %v375_v10 = vpop.f32.mrf.mxu1 }
  0xcf   : > { %v376_v19 = vadd.f32 %v375_v10, %v344_v9 }
  0xd6   : > { %v401_v11 = vpop.f32.mrf.mxu0  ;;  %v426_v17 = vpop.f32.mrf.mxu1 }
  0xd7   : > { %v402_v20 = vadd.f32 %v401_v11, %v376_v19 }
  0xd9   : > { %v427_v21 = vadd.f32 %v426_v17, %v402_v20 }
  0xde   : > { %v453_v24 = vpop.f32.mrf.mxu0  ;;  %v476_v25 = vpop.f32.mrf.mxu1 }
  0xdf   : > { %v454_v27 = vadd.f32 %v453_v24, %v427_v21 }
  0xe1   : > { %v477_v29 = vadd.f32 %v476_v25, %v454_v27 }
  0xe3   : > { %vm483_vm1 = vcmp.eq.f32.partialorder %v1054_v28, %v477_v29 }
  0xe4   : > { %v484_v33 = vsel %vm483_vm1, 1.0, %v1227_v32 }
  0xe5   : > { %v980_v47 = vadd.f32 -0.11111111, %v484_v33 }
  0xe7   : > { %v534_v50 = vand.u32 4294901760, %v980_v47 }
  0xe9   : > { %v535_v51 = vsub.f32 %v980_v47, %v534_v50  ;;  %640 = vmatmul.f32.vlgmr.msra.gmra.mxu3 %v534_v50 }
  0xeb   : > { %694 = vmatmul.f32.vlgmr.msrb.gmra.mxu0 %v535_v51  ;;  %v536_v53 = vand.u32 4294901760, %v535_v51 }
  0xed   : > { %733 = vmatmul.f32.vlgmr.msrb.gmra.mxu1 %v536_v53  ;;  %v537_v54 = vsub.f32 %v535_v51, %v536_v53 }
  0xef   : > { %v538_v55 = vand.u32 4294901760, %v537_v54 }
  0xf1   : > { %539 = vmatmul.f32.vlgmr.msra.gmra.mxu2 %v538_v55  ;;  %839 = vmatmul.f32.vlgmr.msrb.gmra.mxu3 %v534_v50 }
  0xf9   : > { %802 = vmatmul.f32.vlgmr.msrb.gmra.mxu2 %v534_v50 }
 0x168   : > { %v695_v0 = vpop.f32.mrf.mxu0 }
 0x16a   : > { %v734_v12 = vpop.f32.mrf.mxu1 }
 0x16c   : > { %v641_v57 = vpop.f32.mrf.mxu3 }
 0x174   : > { %v540_v58 = vpop.f32.mrf.mxu2  ;;  %v840_v3 = vpop.f32.mrf.mxu3 }
 0x175   : > { %v642_v63 = vadd.f32 %v641_v57, %v540_v58 }
 0x177   : > { %v696_v1 = vadd.f32 %v695_v0, %v642_v63 }
 0x179   : > { %v735_v13 = vadd.f32 %v734_v12, %v696_v1 }
 0x17c   : > { %v803_v22 = vpop.f32.mrf.mxu2 }
 0x17d   : > { %v804_v30 = vadd.f32 %v803_v22, %v735_v13 }
 0x17f   : > { %v841_v37 = vadd.f32 %v840_v3, %v804_v30 }
 0x181   : > { %v844_v39 = vsub.f32 %v843_v36, %v841_v37 }
 0x183   : > { %v851_v40 = vsel %vm850_vm2, %v844_v39, 0.0 }
 0x184   : > { %v852_v41 = vmul.f32 %v851_v40, %v851_v40 }
 0x186   : > { %853 = vadd.xlane.f32.xlu0 %v852_v41 }
 0x1f9   : > { %v854_v42 = vpop.xlane.xlu0 %853 }
 0x1fa   : > { %v855_v43 = vrot.slane %v854_v42, 4 }
 0x1fc   : > { %v856_v44 = vadd.f32 %v855_v43, %v854_v42 }
 0x1fe   : > { %v857_v45 = vrot.slane %v856_v44, 2 }
 0x200   : > { %v858_v46 = vadd.f32 %v857_v45, %v856_v44 }
 0x202   : > { %v859_v48 = vrot.slane %v858_v46, 1 }
 0x204   : > { %v860_v49 = vadd.f32 %v859_v48, %v858_v46 }
 0x206   : > { %984 = vpush %v860_v49 }
 0x237   : > { %s985_s23 = spop %984 }
 0x238   : > { %v862_v52 = vstv %s985_s23 }
 0x239   : > { %864 = vst.msk [vmem:[%s311_s7] sm:$0x1] %vm863_vm3, %v862_v52 }
 0x23a PF: > { %p19_p3 = scmp.ge.s32.totalorder %s1299_s11, 4   ;;  %s1662_s18 = smov %s1213_s19 }
 0x23b   : > { %s1663_s19 = smov %s1217_s20  ;;  %s1664_s20 = smov %s1311_s14 }
 0x23c   : > { %s1665_s21 = smov %s1299_s11  ;;  %21 = sbr.rel (!%p19_p3) target bundleno = 6 (0x6), region = 101 }
 0x241   :  { %882 = vsyncpa [#allocation3], 1 }
 0x242   :  { %884 = vsyncpa [#allocation3 + $0x1], 1 }
 0x243   :  { %885 = vsyncpa [#allocation5], 1 }
 0x244   :  { %887 = vsyncpa [#allocation5 + $0x1], 1 }
 0x245   :  { %888 = vsyncpa [#allocation8], 1 }

</bundles_post_ra>
